<compile_context>
chip_gen: v5e
topology: v5e:2x2
jax: 0.10.0
libtpu: 0.0.40
codegen_flags: <defaults>
</compile_context>

<pallas_src>
import functools

import numpy as np
import jax
import jax.numpy as jnp
from jax.experimental import pallas as pl
from jax.experimental.pallas import tpu as pltpu

LANE = 128
HIDDEN = 64


def _round_up(x, m):
    return (x + m - 1) // m * m


def _orthogonal_init(key, shape, gain):
    """Orthogonal init matching torch.nn.init.orthogonal_ semantics:
    QR of the tall orientation, sign-corrected (guarded against zero diag)."""
    rows, cols = shape
    a = jax.random.normal(key, (max(rows, cols), min(rows, cols)), dtype=jnp.float32)
    q, r = jnp.linalg.qr(a)
    d = jnp.diag(r)
    q = q * jnp.where(d == 0, 1.0, jnp.sign(d))[None, :]
    if rows < cols:
        q = q.T
    return gain * q


def ppo_kernel(x_ref, w1_ref, b1_ref, w2_ref, b2_ref, w3_ref, b3_ref, o_ref):
    # One batch tile: three fused matmuls (bf16 operands -> f32 accumulation),
    # bias adds and tanh in f32, f32 output.
    h1 = jnp.tanh(
        jnp.dot(x_ref[...], w1_ref[...], preferred_element_type=jnp.float32)
        + b1_ref[...]
    )
    h2 = jnp.tanh(
        jnp.dot(h1.astype(w2_ref.dtype), w2_ref[...],
                preferred_element_type=jnp.float32)
        + b2_ref[...]
    )
    o_ref[...] = (
        jnp.dot(h2.astype(w3_ref.dtype), w3_ref[...],
                preferred_element_type=jnp.float32)
        + b3_ref[...]
    ).astype(o_ref.dtype)


@functools.partial(jax.jit, static_argnames=("n_actions", "block_batch"))
def ppo_forward(x, params, n_actions, block_batch=1024):
    """x: [batch, n_observations] (any float dtype).  params from make_params."""
    w1, b1, w2, b2, w3, b3 = params
    batch, n_obs = x.shape
    obs_w, hid_w = w1.shape
    act_w = w3.shape[1]

    # Batch: pad only to the sublane multiple (8), never to the tile size.
    batch_p = _round_up(batch, 8)
    if batch_p <= 256:
        tb = batch_p  # single small tile
    else:
        # >= 2 grid steps so v7x megacore can split the batch axis; cap at block_batch.
        tb = min(block_batch, _round_up(pl.cdiv(batch_p, 2), 8))
    grid = pl.cdiv(batch_p, tb)  # partial trailing tile is masked (rows independent)

    # x at (nearly) natural width: rows -> mult of 8, cols -> obs_w (mult of 8),
    # cast to the weights' compute dtype (bf16); accumulation stays f32 in-kernel.
    x = x.astype(w1.dtype)
    if batch_p != batch or obs_w != n_obs:
        x = jnp.pad(x, ((0, batch_p - batch), (0, obs_w - n_obs)))

    out = pl.pallas_call(
        ppo_kernel,
        out_shape=jax.ShapeDtypeStruct((batch_p, act_w), jnp.float32),
        grid_spec=pltpu.PrefetchScalarGridSpec(
            num_scalar_prefetch=0,
            grid=(grid,),
            in_specs=[
                pl.BlockSpec((tb, obs_w), lambda i: (i, 0)),     # x tile (narrow obs)
                pl.BlockSpec((obs_w, hid_w), lambda i: (0, 0)),  # w1 (resident)
                pl.BlockSpec((1, hid_w), lambda i: (0, 0)),      # b1
                pl.BlockSpec((hid_w, hid_w), lambda i: (0, 0)),  # w2
                pl.BlockSpec((1, hid_w), lambda i: (0, 0)),      # b2
                pl.BlockSpec((hid_w, act_w), lambda i: (0, 0)),  # w3 (narrow out)
                pl.BlockSpec((1, act_w), lambda i: (0, 0)),      # b3
            ],
            out_specs=pl.BlockSpec((tb, act_w), lambda i: (i, 0)),
        ),
        compiler_params=pltpu.CompilerParams(
            dimension_semantics=("parallel",),  # shards batch grid across TCs on v7x
        ),
    )(x, w1, b1, w2, b2, w3, b3)

    # Narrow (mult-of-8) output: this slice only touches batch*act_w*4 bytes.
    return out[:batch, :n_actions]


def make_params(key, n_observations, n_actions, std, compute_dtype=jnp.bfloat16):
    """Deterministic parameters mirroring PPO.__init__, stored transposed
    ([in, out]), zero-padded: obs/actions to multiples of 8 (narrow, fewer HBM
    bytes), hidden to 128 (lane-dense for the two big matmuls)."""
    obs_w = _round_up(n_observations, 8)
    hid_w = _round_up(HIDDEN, LANE)
    act_w = _round_up(n_actions, 8)

    k1, k2, k3 = jax.random.split(key, 3)
    sqrt2 = float(np.sqrt(2.0))
    # PyTorch Linear weight is (out, in); store transposed (in, out).
    w1 = _orthogonal_init(k1, (HIDDEN, n_observations), sqrt2).T   # (n_obs, 64)
    w2 = _orthogonal_init(k2, (HIDDEN, HIDDEN), sqrt2).T           # (64, 64)
    w3 = _orthogonal_init(k3, (n_actions, HIDDEN), std).T          # (64, n_act)

    # Zero padding keeps the math exact: padded inputs/weights contribute 0,
    # padded hidden units are tanh(0)=0 and meet zero rows in the next layer.
    w1p = jnp.zeros((obs_w, hid_w), jnp.float32).at[:n_observations, :HIDDEN].set(w1)
    w2p = jnp.zeros((hid_w, hid_w), jnp.float32).at[:HIDDEN, :HIDDEN].set(w2)
    w3p = jnp.zeros((hid_w, act_w), jnp.float32).at[:HIDDEN, :n_actions].set(w3)
    b1p = jnp.zeros((1, hid_w), jnp.float32)   # bias_const = 0.0 (kept general)
    b2p = jnp.zeros((1, hid_w), jnp.float32)
    b3p = jnp.zeros((1, act_w), jnp.float32)
    return (w1p.astype(compute_dtype), b1p,
            w2p.astype(compute_dtype), b2p,
            w3p.astype(compute_dtype), b3p)


def reference_forward(x, params, n_actions):
    """Pure-JAX reference following the exact same dtype path as the kernel."""
    w1, b1, w2, b2, w3, b3 = params
    obs_w = w1.shape[0]
    xp = x.astype(w1.dtype)
    if xp.shape[1] != obs_w:
        xp = jnp.pad(xp, ((0, 0), (0, obs_w - xp.shape[1])))
    h1 = jnp.tanh(jnp.dot(xp, w1, preferred_element_type=jnp.float32) + b1)
    h2 = jnp.tanh(jnp.dot(h1.astype(w2.dtype), w2,
                          preferred_element_type=jnp.float32) + b2)
    out = jnp.dot(h2.astype(w3.dtype), w3,
                  preferred_element_type=jnp.float32) + b3
    return out[:, :n_actions]


if __name__ == "__main__":
    n_observations, n_actions, std = 16, 4, 0.01

    key = jax.random.PRNGKey(0)
    k_params, k_x_small, k_x_big = jax.random.split(key, 3)
    params = make_params(k_params, n_observations, n_actions, std)

    # Small batch (typical single-env policy evaluation); batch padded 2 -> 8.
    x_small = jax.random.normal(k_x_small, (2, n_observations), dtype=jnp.float32)
    out_small = ppo_forward(x_small, params, n_actions=n_actions)
    jax.block_until_ready(out_small)
    ref_small = reference_forward(x_small, params, n_actions)
    np.testing.assert_allclose(
        np.asarray(out_small), np.asarray(ref_small), rtol=2e-3, atol=2e-3
    )

    # Larger ragged batch exercises the multi-step grid and the masked trailing
    # tile (batch=1000 -> tb=504, grid=(2,), second tile partially masked).
    x_big = jax.random.normal(k_x_big, (1000, n_observations), dtype=jnp.float32)
    out_big = ppo_forward(x_big, params, n_actions=n_actions)
    jax.block_until_ready(out_big)
    ref_big = reference_forward(x_big, params, n_actions)
    np.testing.assert_allclose(
        np.asarray(out_big), np.asarray(ref_big), rtol=2e-3, atol=2e-3
    )

    print("KERNEL_OK")
</pallas_src>

<mosaic_0001>
module attributes {stable_mosaic.version = 11 : i64} {
  func.func @ppo_kernel(%arg0: i32, %arg1: memref<8x16xbf16, #tpu.memory_space<vmem>>, %arg2: memref<16x128xbf16, #tpu.memory_space<vmem>>, %arg3: memref<1x128xf32, #tpu.memory_space<vmem>>, %arg4: memref<128x128xbf16, #tpu.memory_space<vmem>>, %arg5: memref<1x128xf32, #tpu.memory_space<vmem>>, %arg6: memref<128x8xbf16, #tpu.memory_space<vmem>>, %arg7: memref<1x8xf32, #tpu.memory_space<vmem>>, %arg8: memref<8x8xf32, #tpu.memory_space<vmem>>) attributes {dimension_semantics = [#tpu.dimension_semantics<parallel>], iteration_bounds = array<i64: 1>, scalar_prefetch = 0 : i64, scratch_operands = 0 : i64, tpu.core_type = #tpu.core_type<tc>, window_params = [{transform_indices = @transform_0, window_bounds = array<i64: 8, 16>}, {pipeline_mode = #tpu.pipeline_mode<synchronous>, transform_indices = @transform_1, window_bounds = array<i64: 16, 128>}, {pipeline_mode = #tpu.pipeline_mode<synchronous>, transform_indices = @transform_2, window_bounds = array<i64: 1, 128>}, {pipeline_mode = #tpu.pipeline_mode<synchronous>, transform_indices = @transform_3, window_bounds = array<i64: 128, 128>}, {pipeline_mode = #tpu.pipeline_mode<synchronous>, transform_indices = @transform_4, window_bounds = array<i64: 1, 128>}, {pipeline_mode = #tpu.pipeline_mode<synchronous>, transform_indices = @transform_5, window_bounds = array<i64: 128, 8>}, {pipeline_mode = #tpu.pipeline_mode<synchronous>, transform_indices = @transform_6, window_bounds = array<i64: 1, 8>}, {transform_indices = @transform_7, window_bounds = array<i64: 8, 8>}]} {
    %c0 = arith.constant 0 : index
    %c0_0 = arith.constant 0 : index
    %0 = vector.load %arg1[%c0, %c0_0] : memref<8x16xbf16, #tpu.memory_space<vmem>>, vector<8x16xbf16>
    %c0_1 = arith.constant 0 : index
    %c0_2 = arith.constant 0 : index
    %1 = vector.load %arg2[%c0_1, %c0_2] : memref<16x128xbf16, #tpu.memory_space<vmem>>, vector<16x128xbf16>
    %cst = arith.constant dense<0.000000e+00> : vector<8x128xf32>
    %2 = tpu.matmul %0, %1, %cst {dimension_numbers = #tpu.dot_dimension_numbers<[1], [0], [0], [1], [0, 0, 1, 1], [], []>} : vector<8x16xbf16>, vector<16x128xbf16>, vector<8x128xf32> -> vector<8x128xf32>
    %c0_3 = arith.constant 0 : index
    %c0_4 = arith.constant 0 : index
    %3 = vector.load %arg3[%c0_3, %c0_4] : memref<1x128xf32, #tpu.memory_space<vmem>>, vector<1x128xf32>
    %4 = vector.broadcast %3 : vector<1x128xf32> to vector<8x128xf32>
    %5 = arith.addf %2, %4 : vector<8x128xf32>
    %6 = math.tanh %5 : vector<8x128xf32>
    %7 = arith.truncf %6 : vector<8x128xf32> to vector<8x128xbf16>
    %c0_5 = arith.constant 0 : index
    %c0_6 = arith.constant 0 : index
    %8 = vector.load %arg4[%c0_5, %c0_6] : memref<128x128xbf16, #tpu.memory_space<vmem>>, vector<128x128xbf16>
    %cst_7 = arith.constant dense<0.000000e+00> : vector<8x128xf32>
    %9 = tpu.matmul %7, %8, %cst_7 {dimension_numbers = #tpu.dot_dimension_numbers<[1], [0], [0], [1], [0, 0, 1, 1], [], []>} : vector<8x128xbf16>, vector<128x128xbf16>, vector<8x128xf32> -> vector<8x128xf32>
    %c0_8 = arith.constant 0 : index
    %c0_9 = arith.constant 0 : index
    %10 = vector.load %arg5[%c0_8, %c0_9] : memref<1x128xf32, #tpu.memory_space<vmem>>, vector<1x128xf32>
    %11 = vector.broadcast %10 : vector<1x128xf32> to vector<8x128xf32>
    %12 = arith.addf %9, %11 : vector<8x128xf32>
    %13 = math.tanh %12 : vector<8x128xf32>
    %14 = arith.truncf %13 : vector<8x128xf32> to vector<8x128xbf16>
    %c0_10 = arith.constant 0 : index
    %c0_11 = arith.constant 0 : index
    %15 = vector.load %arg6[%c0_10, %c0_11] : memref<128x8xbf16, #tpu.memory_space<vmem>>, vector<128x8xbf16>
    %cst_12 = arith.constant dense<0.000000e+00> : vector<8x8xf32>
    %16 = tpu.matmul %14, %15, %cst_12 {dimension_numbers = #tpu.dot_dimension_numbers<[1], [0], [0], [1], [0, 0, 1, 1], [], []>} : vector<8x128xbf16>, vector<128x8xbf16>, vector<8x8xf32> -> vector<8x8xf32>
    %c0_13 = arith.constant 0 : index
    %c0_14 = arith.constant 0 : index
    %17 = vector.load %arg7[%c0_13, %c0_14] : memref<1x8xf32, #tpu.memory_space<vmem>>, vector<1x8xf32>
    %18 = vector.broadcast %17 : vector<1x8xf32> to vector<8x8xf32>
    %19 = arith.addf %16, %18 : vector<8x8xf32>
    %c0_15 = arith.constant 0 : index
    %c0_16 = arith.constant 0 : index
    %20 = vector.load %arg8[%c0_15, %c0_16] : memref<8x8xf32, #tpu.memory_space<vmem>>, vector<8x8xf32>
    tpu.vector_store %arg8[%c0_15, %c0_16], %19 {strides = array<i32>} : memref<8x8xf32, #tpu.memory_space<vmem>>, vector<8x8xf32>,
    return
  }
  func.func @transform_0(%arg0: i32) -> (i32, i32) {
    %c0_i32 = arith.constant 0 : i32
    %c0_i32_0 = arith.constant 0 : i32
    return %arg0, %c0_i32 : i32, i32
  }
  func.func @transform_1(%arg0: i32) -> (i32, i32) {
    %c0_i32 = arith.constant 0 : i32
    %c0_i32_0 = arith.constant 0 : i32
    %c0_i32_1 = arith.constant 0 : i32
    return %c0_i32, %c0_i32_0 : i32, i32
  }
  func.func @transform_2(%arg0: i32) -> (i32, i32) {
    %c0_i32 = arith.constant 0 : i32
    %c0_i32_0 = arith.constant 0 : i32
    %c0_i32_1 = arith.constant 0 : i32
    return %c0_i32, %c0_i32_0 : i32, i32
  }
  func.func @transform_3(%arg0: i32) -> (i32, i32) {
    %c0_i32 = arith.constant 0 : i32
    %c0_i32_0 = arith.constant 0 : i32
    %c0_i32_1 = arith.constant 0 : i32
    return %c0_i32, %c0_i32_0 : i32, i32
  }
  func.func @transform_4(%arg0: i32) -> (i32, i32) {
    %c0_i32 = arith.constant 0 : i32
    %c0_i32_0 = arith.constant 0 : i32
    %c0_i32_1 = arith.constant 0 : i32
    return %c0_i32, %c0_i32_0 : i32, i32
  }
  func.func @transform_5(%arg0: i32) -> (i32, i32) {
    %c0_i32 = arith.constant 0 : i32
    %c0_i32_0 = arith.constant 0 : i32
    %c0_i32_1 = arith.constant 0 : i32
    return %c0_i32, %c0_i32_0 : i32, i32
  }
  func.func @transform_6(%arg0: i32) -> (i32, i32) {
    %c0_i32 = arith.constant 0 : i32
    %c0_i32_0 = arith.constant 0 : i32
    %c0_i32_1 = arith.constant 0 : i32
    return %c0_i32, %c0_i32_0 : i32, i32
  }
  func.func @transform_7(%arg0: i32) -> (i32, i32) {
    %c0_i32 = arith.constant 0 : i32
    %c0_i32_0 = arith.constant 0 : i32
    return %arg0, %c0_i32 : i32, i32
  }
}

</mosaic_0001>

<bundles_post_ra>
// kernel: ppo_forward.1
= control target key start
LH: loop header
LB: loop body
LE: loop exit
PB: predicated region body
PF: predicated region fallthrough
CT: control target
= control target key end

     0   :  { %vm40_vm0 = vcmask 130048   ;;  %vm223_vm1 = vcmask 64512   ;;  %s428_s1 = inlined_call_operand.vmem [shape: bf16[16,128], index: 1, kind: input, shape index: {}]   ;;  %s429_s0 = inlined_call_operand.vmem [shape: bf16[8,16], index: 0, kind: input, shape index: {}]   ;;  %s430_s3 = inlined_call_operand.vmem [shape: bf16[128,128], index: 3, kind: input, shape index: {}]   ;;  %s431_s2 = inlined_call_operand.vmem [shape: f32[1,128], index: 2, kind: input, shape index: {}]   ;;  %s432_s4 = inlined_call_operand.vmem [shape: f32[1,128], index: 4, kind: input, shape index: {}]   ;;  %s433_s5 = inlined_call_operand.vmem [shape: bf16[128,8], index: 5, kind: input, shape index: {}]   ;;  %s434_s6 = inlined_call_operand.vmem [shape: f32[1,8], index: 6, kind: input, shape index: {}]   ;;  %s435_s7 = inlined_call_operand.vmem [shape: f32[8,8], index: 7, kind: output, shape index: {}]  }
   0x1   :  { %v298_v0 = vld [vmem:[%s428_s1] sm:$0xff]  ;;  %v306_v1 = vld [vmem:[%s430_s3 + $0x38] sm:$0xff]  ;;  %v305_v3 = vld [vmem:[%s430_s3 + $0x30] sm:$0xff] }
   0x2   :  { %51 = vmatpush.bf16.msra.mxu0 %v298_v0  ;;  %v27_v2 = vld [vmem:[%s429_s0] sm:$0xf]  ;;  %127 = vmatpush.bf16.msra.mxu1 %v306_v1  ;;  %v304_v4 = vld [vmem:[%s430_s3 + $0x28] sm:$0xff]  ;;  %v302_v6 = vld [vmem:[%s430_s3 + $0x18] sm:$0xff] }
   0x3   :  { %v303_v5 = vld [vmem:[%s430_s3 + $0x20] sm:$0xff]  ;;  %v301_v7 = vld [vmem:[%s430_s3 + $0x10] sm:$0xff]  ;;  %v300_v8 = vld [vmem:[%s430_s3 + $0x8] sm:$0xff] }
   0x4   :  { %v299_v9 = vld [vmem:[%s430_s3] sm:$0xff]  ;;  %v314_v10 = vld [vmem:[%s433_s5 + $0x38] sm:$0xff]  ;;  %v313_v11 = vld [vmem:[%s433_s5 + $0x30] sm:$0xff] }
   0x5   :  { %233 = vmatmul.msk.bf16.vlgmr.msra.gmra.mxu0 %vm40_vm0, %v27_v2  ;;  %210 = vmatpush.bf16.msra.mxu2 %v314_v10  ;;  %v312_v12 = vld [vmem:[%s433_s5 + $0x28] sm:$0xff]  ;;  %v311_v13 = vld [vmem:[%s433_s5 + $0x20] sm:$0xff]  ;;  %v310_v14 = vld [vmem:[%s433_s5 + $0x18] sm:$0xff] }
   0x6   :  { %128 = vmatpush.bf16.msra.mxu1 %v305_v3  ;;  %v315_v15 = vld [vmem:[%s431_s2] ss:$0 sm:$0xff]  ;;  %v309_v21 = vld [vmem:[%s433_s5 + $0x10] sm:$0xff]  ;;  %v308_v22 = vld [vmem:[%s433_s5 + $0x8] sm:$0xff] }
   0x7   :  { %v307_v23 = vld [vmem:[%s433_s5] sm:$0xff] }
   0x8   :  { %v316_v24 = vld [vmem:[%s432_s4] ss:$0 sm:$0xff] }
   0x9   :  { %211 = vmatpush.bf16.msra.mxu2 %v313_v11  ;;  %v317_v30 = vld [vmem:[%s434_s6] ss:$0 sm:$0xff] }
   0xa   :  { %129 = vmatpush.bf16.msra.mxu1 %v304_v4 }
   0xd   :  { %212 = vmatpush.bf16.msra.mxu2 %v312_v12 }
   0xe   :  { %130 = vmatpush.bf16.msra.mxu1 %v303_v5 }
  0x11   :  { %213 = vmatpush.bf16.msra.mxu2 %v311_v13 }
  0x12   :  { %131 = vmatpush.bf16.msra.mxu1 %v302_v6 }
  0x15   :  { %214 = vmatpush.bf16.msra.mxu2 %v310_v14 }
  0x16   :  { %132 = vmatpush.bf16.msra.mxu1 %v301_v7 }
  0x19   :  { %215 = vmatpush.bf16.msra.mxu2 %v309_v21 }
  0x1a   :  { %133 = vmatpush.bf16.msra.mxu1 %v300_v8 }
  0x1d   :  { %216 = vmatpush.bf16.msra.mxu2 %v308_v22 }
  0x1e   :  { %134 = vmatpush.bf16.msra.mxu1 %v299_v9 }
  0x21   :  { %217 = vmatpush.bf16.msra.mxu2 %v307_v23 }
  0x82   :  { %v53_v16 = vpop.f32.mrf.mxu0 }
  0x83   :  { %v54_v17 = vadd.f32 %v315_v15, %v53_v16 }
  0x85   :  { %318 = vtanh.f32 %v54_v17 }
  0x8a   :  { %v55_v18 = vpop.f32.mrf.mxu0 }
  0x8b   :  { %v319_v19 = vpop.eup %318 }
  0x8c   :  { %v58_v20 = vpack.c.bf16 %v319_v19, %v319_v19 }
  0x8e   :  { %135 = vmatmul.bf16.vlgmr.msra.gmra.mxu1 %v58_v20 }
 0x10b   :  { %v136_v25 = vpop.f32.mrf.mxu1 }
 0x10c   :  { %v137_v26 = vadd.f32 %v316_v24, %v136_v25 }
 0x10e   :  { %320 = vtanh.f32 %v137_v26 }
 0x113   :  { %v138_v27 = vpop.f32.mrf.mxu1 }
 0x114   :  { %v321_v28 = vpop.eup %320 }
 0x115   :  { %v141_v29 = vpack.c.bf16 %v321_v28, %v321_v28 }
 0x117   :  { %218 = vmatmul.bf16.vlgmr.msra.gmra.mxu2 %v141_v29 }
 0x19a   :  { %v219_v31 = vpop.f32.mrf.mxu2 }
 0x19b   :  { %v220_v32 = vadd.f32 %v317_v30, %v219_v31 }
 0x19d   :  { %224 = vst.msk [vmem:[%s435_s7] sm:$0xff] %vm223_vm1, %v220_v32 }
 0x1a2   :  { %v221_v33 = vpop.f32.mrf.mxu2 }

</bundles_post_ra>
